<compile_context>
chip_gen: v7x
topology: tpu7x:2x2x1
jax: 0.10.0
libtpu: 0.0.40
codegen_flags: <defaults>
</compile_context>

<pallas_src>
import jax
import jax.numpy as jnp
from jax.experimental import pallas as pl
from jax.experimental.pallas import tpu as pltpu


def _banded_conv(slab_bf16, w_ref, m_rows, wc):
    """3 accumulating MXU dots: one per row tap of a 3x3 conv.

    slab_bf16 : (m_rows + 2, WC) bf16 rows (1-row halo on each side)
    w_ref     : (3*WC, WC) bf16 banded weight ref; rows [kh*WC,(kh+1)*WC) are
                the kh-th row tap.
    Returns (m_rows, WC) f32 accumulator.
    """
    acc = jnp.dot(slab_bf16[0:m_rows, :], w_ref[0:wc, :],
                  preferred_element_type=jnp.float32)
    for kh in (1, 2):
        acc = acc + jnp.dot(slab_bf16[kh:kh + m_rows, :],
                            w_ref[kh * wc:(kh + 1) * wc, :],
                            preferred_element_type=jnp.float32)
    return acc


def basic_block_kernel(xp_ref, w1_ref, s1_ref, t1_ref, w2_ref, s2_ref, t2_ref,
                       out_ref):
    # xp_ref  : (1, H+4, WC) bf16  input padded by 2 zero rows top/bottom with
    #                              (W, C) flattened into lanes. The residual is
    #                              read from the same block (single input stream).
    # w?_ref  : (3*WC, WC)   bf16  banded conv weights (see band_weights()).
    # s?/t?   : (1, WC)      f32   folded BN scale / shift, channel-tiled over W.
    # out_ref : (1, TH, WC)  f32   lane-dense output tile.
    TH = out_ref.shape[1]
    WC = out_ref.shape[2]
    H = pl.num_programs(1) * TH

    r0 = pl.multiple_of(pl.program_id(1) * TH, TH)

    # Rows of the H-padded input needed by this tile (2-row halo for the two
    # stacked 3x3 convs): padded rows [r0, r0 + TH + 4).  Already bf16, no cast.
    x_slab = xp_ref[0, pl.ds(r0, TH + 4), :]                      # (TH+4, WC)

    # ---- conv1: 3 accumulating MXU dots (no patch materialization) ----
    acc1 = _banded_conv(x_slab, w1_ref, TH + 2, WC)               # (TH+2, WC) f32

    # ---- bn1 + relu (f32) ----
    y1 = jnp.maximum(acc1 * s1_ref[...] + t1_ref[...], 0.0)

    # Halo rows of y1 that fall outside [0, H) must be exactly zero so conv2
    # sees proper zero padding at the top/bottom image boundary (BN shift +
    # ReLU would otherwise make them nonzero).  With the default tile_h == H
    # this is the only h tile, so there is nothing to gate with pl.when; the
    # select costs 2 extra rows' worth of VPU work.
    g = r0 - 1 + jax.lax.broadcasted_iota(jnp.int32, (TH + 2, 1), 0)
    y1 = jnp.where((g >= 0) & (g < H), y1, 0.0)

    # Cast exactly once, then slice the bf16 value for the three conv2 taps.
    y1b = y1.astype(jnp.bfloat16)                                  # (TH+2, WC)

    # ---- conv2: 3 accumulating MXU dots (W padding implicit in the band) ----
    acc2 = _banded_conv(y1b, w2_ref, TH, WC)                       # (TH, WC) f32

    # ---- bn2 + identity residual + relu (f32) ----
    res = x_slab[2:2 + TH, :].astype(jnp.float32)                  # (TH, WC)
    out = jnp.maximum(acc2 * s2_ref[...] + t2_ref[...] + res, 0.0)
    out_ref[0] = out.astype(out_ref.dtype)


def band_weights(w_hwio, W, C):
    """Fold the 3 W-taps + channel mixing of a 3x3 conv into a banded matrix.

    Returns Wb of shape (3*W*C, W*C) with
      Wb[(kh*W + wp)*C + ci, w*C + co] = w_hwio[kh, wp - w + 1, ci, co]
    when |wp - w| <= 1 and 0 otherwise (implicit SAME zero-padding along W).
    """
    wp = jnp.arange(W)[:, None]              # source (input) column
    w_ = jnp.arange(W)[None, :]              # output column
    kw = wp - w_ + 1                         # (W, W)
    valid = (kw >= 0) & (kw <= 2)
    kw_c = jnp.clip(kw, 0, 2)
    blocks = w_hwio[:, kw_c, :, :]           # (3, W, W, C, C) = [kh, wp, w, ci, co]
    blocks = blocks * valid[None, :, :, None, None].astype(w_hwio.dtype)
    # (kh, wp, ci, w, co) -> (3*W*C, W*C)
    return blocks.transpose(0, 1, 3, 2, 4).reshape(3 * W * C, W * C)


def basic_block_forward(x_nhwc, params, *, tile_h=None):
    """x_nhwc: (N, H, W, C) float32.  Returns (N, H, W, C) float32."""
    N, H, W, C = x_nhwc.shape
    WC = W * C
    eps = 1e-5

    # Lane-dense layout: the flattened (W, C) axis must fill whole 128-lane
    # vregs, otherwise every store degrades to a masked vst.
    assert WC % 128 == 0, "W*C must be a multiple of 128 for the banded path"

    # Full-height tiles by default (grid collapses to (N, 1)): large matmul M,
    # minimal grid-step overhead; N >= 2 keeps both v7x TensorCores busy.
    if tile_h is None:
        tile_h = H if H <= 256 else 256
    tile_h = min(tile_h, H)
    assert H % tile_h == 0, "H must be divisible by the row tile"

    w1, b1, g1, be1, m1, v1, w2, b2, g2, be2, m2, v2 = params

    # Fold conv bias + BN (inference, running stats) into per-channel
    # scale/shift, tiled across W for the (.., W*C) lane-dense layout.
    s1 = g1 / jnp.sqrt(v1 + eps)
    t1 = be1 + s1 * (b1 - m1)
    s2 = g2 / jnp.sqrt(v2 + eps)
    t2 = be2 + s2 * (b2 - m2)
    s1t = jnp.tile(s1, W).reshape(1, WC)
    t1t = jnp.tile(t1, W).reshape(1, WC)
    s2t = jnp.tile(s2, W).reshape(1, WC)
    t2t = jnp.tile(t2, W).reshape(1, WC)

    # Banded conv weights in bf16 (MXU-native); accumulation stays f32.
    W1 = band_weights(w1, W, C).astype(jnp.bfloat16)
    W2 = band_weights(w2, W, C).astype(jnp.bfloat16)

    # Pad along H only (2-row halo for the two stacked 3x3 convs), flatten
    # (W, C) into lanes and store the activations in HBM as bf16: halves
    # input HBM traffic / resident-image VMEM (biggest win on v5e's ~820 GB/s
    # HBM) and removes all in-kernel casts of x.
    xp = jnp.pad(x_nhwc, ((0, 0), (2, 2), (0, 0), (0, 0)))
    xp = xp.astype(jnp.bfloat16).reshape(N, H + 4, WC)

    grid = (N, H // tile_h)

    flops = 4 * N * H * W * 9 * C * C                 # two convs, 2 flops/MAC
    bytes_accessed = (xp.size * 2 + N * H * WC * 4
                      + W1.size * 2 + W2.size * 2 + 4 * WC * 4)

    # 48 MiB scoped-VMEM cap fits every generation (v7x physical VMEM is
    # 64 MiB per TC); actual footprint at these shapes is well under 1 MiB.
    vmem_limit = 48 * 1024 * 1024

    out = pl.pallas_call(
        basic_block_kernel,
        out_shape=jax.ShapeDtypeStruct((N, H, WC), jnp.float32),
        grid_spec=pltpu.PrefetchScalarGridSpec(
            num_scalar_prefetch=0,
            grid=grid,
            in_specs=[
                # Padded image of one batch element, resident across h tiles.
                pl.BlockSpec((1, H + 4, WC), lambda n, h: (n, 0, 0)),
                # Invariant operands: constant index_map -> fetched once, kept.
                pl.BlockSpec((3 * WC, WC), lambda n, h: (0, 0)),
                pl.BlockSpec((1, WC), lambda n, h: (0, 0)),
                pl.BlockSpec((1, WC), lambda n, h: (0, 0)),
                pl.BlockSpec((3 * WC, WC), lambda n, h: (0, 0)),
                pl.BlockSpec((1, WC), lambda n, h: (0, 0)),
                pl.BlockSpec((1, WC), lambda n, h: (0, 0)),
            ],
            out_specs=pl.BlockSpec((1, tile_h, WC), lambda n, h: (n, h, 0)),
        ),
        compiler_params=pltpu.CompilerParams(
            dimension_semantics=("parallel", "parallel"),
            vmem_limit_bytes=vmem_limit),
        cost_estimate=pl.CostEstimate(flops=flops, transcendentals=0,
                                      bytes_accessed=bytes_accessed),
    )(xp, W1, s1t, t1t, W2, s2t, t2t)

    return out.reshape(N, H, W, C)


def reference_forward(x_nhwc, params):
    eps = 1e-5
    w1, b1, g1, be1, m1, v1, w2, b2, g2, be2, m2, v2 = params

    def conv(x, w, b):
        y = jax.lax.conv_general_dilated(
            x, w, window_strides=(1, 1), padding="SAME",
            dimension_numbers=("NHWC", "HWIO", "NHWC"))
        return y + b

    def bn(y, g, be, m, v):
        return (y - m) / jnp.sqrt(v + eps) * g + be

    out = jax.nn.relu(bn(conv(x_nhwc, w1, b1), g1, be1, m1, v1))
    out = bn(conv(out, w2, b2), g2, be2, m2, v2) + x_nhwc
    return jax.nn.relu(out)


if __name__ == "__main__":
    # Small shapes consistent with BasicBlock(inplanes=planes, downsample=None).
    N, H, W, C = 2, 16, 16, 8   # inplanes = planes = 8 (identity residual)

    key = jax.random.PRNGKey(0)
    keys = jax.random.split(key, 8)

    # Deterministic synthetic parameters (PyTorch shapes -> HWIO layout).
    w1 = 0.1 * jax.random.normal(keys[0], (3, 3, C, C), jnp.float32)  # HWIO
    b1 = 0.1 * jax.random.normal(keys[1], (C,), jnp.float32)
    g1 = 1.0 + 0.1 * jax.random.normal(keys[2], (C,), jnp.float32)
    be1 = 0.1 * jax.random.normal(keys[3], (C,), jnp.float32)
    m1 = jnp.zeros((C,), jnp.float32)       # running_mean default
    v1 = jnp.ones((C,), jnp.float32)        # running_var default

    w2 = 0.1 * jax.random.normal(keys[4], (3, 3, C, C), jnp.float32)
    b2 = 0.1 * jax.random.normal(keys[5], (C,), jnp.float32)
    g2 = 1.0 + 0.1 * jax.random.normal(keys[6], (C,), jnp.float32)
    be2 = 0.1 * jax.random.normal(keys[7], (C,), jnp.float32)
    m2 = jnp.zeros((C,), jnp.float32)
    v2 = jnp.ones((C,), jnp.float32)

    params = (w1, b1, g1, be1, m1, v1, w2, b2, g2, be2, m2, v2)

    x = jax.random.normal(jax.random.PRNGKey(42), (N, H, W, C), jnp.float32)

    out = basic_block_forward(x, params)
    out = jax.block_until_ready(out)

    ref = reference_forward(x, params)
    assert out.shape == (N, H, W, C)
    # Tolerance loosened: activations/weights are bf16 on the MXU (including
    # the HBM-resident input, hence the residual); accumulation stays f32.
    assert jnp.allclose(out, ref, atol=5e-2, rtol=5e-2), "mismatch vs reference"

    print("KERNEL_OK")
</pallas_src>

<mosaic_0001>
module attributes {stable_mosaic.version = 11 : i64} {
  func.func @basic_block_kernel(%arg0: i32, %arg1: i32, %arg2: memref<1x20x128xbf16, #tpu.memory_space<vmem>>, %arg3: memref<384x128xbf16, #tpu.memory_space<vmem>>, %arg4: memref<1x128xf32, #tpu.memory_space<vmem>>, %arg5: memref<1x128xf32, #tpu.memory_space<vmem>>, %arg6: memref<384x128xbf16, #tpu.memory_space<vmem>>, %arg7: memref<1x128xf32, #tpu.memory_space<vmem>>, %arg8: memref<1x128xf32, #tpu.memory_space<vmem>>, %arg9: memref<1x16x128xf32, #tpu.memory_space<vmem>>) attributes {dimension_semantics = [#tpu.dimension_semantics<parallel>, #tpu.dimension_semantics<parallel>], iteration_bounds = array<i64: 2, 1>, scalar_prefetch = 0 : i64, scratch_operands = 0 : i64, tpu.core_type = #tpu.core_type<tc>, window_params = [{transform_indices = @transform_0, window_bounds = array<i64: 1, 20, 128>}, {pipeline_mode = #tpu.pipeline_mode<synchronous>, transform_indices = @transform_1, window_bounds = array<i64: 384, 128>}, {pipeline_mode = #tpu.pipeline_mode<synchronous>, transform_indices = @transform_2, window_bounds = array<i64: 1, 128>}, {pipeline_mode = #tpu.pipeline_mode<synchronous>, transform_indices = @transform_3, window_bounds = array<i64: 1, 128>}, {pipeline_mode = #tpu.pipeline_mode<synchronous>, transform_indices = @transform_4, window_bounds = array<i64: 384, 128>}, {pipeline_mode = #tpu.pipeline_mode<synchronous>, transform_indices = @transform_5, window_bounds = array<i64: 1, 128>}, {pipeline_mode = #tpu.pipeline_mode<synchronous>, transform_indices = @transform_6, window_bounds = array<i64: 1, 128>}, {transform_indices = @transform_7, window_bounds = array<i64: 1, 16, 128>}]} {
    %c16_i32 = arith.constant 16 : i32
    %0 = arith.muli %arg1, %c16_i32 : i32
    %1 = tpu.assume_multiple %0, 16 : i32
    %c0 = arith.constant 0 : index
    %2 = arith.index_cast %1 : i32 to index
    %c0_0 = arith.constant 0 : index
    %3 = vector.load %arg2[%c0, %2, %c0_0] : memref<1x20x128xbf16, #tpu.memory_space<vmem>>, vector<1x20x128xbf16>
    %4 = vector.shape_cast %3 : vector<1x20x128xbf16> to vector<20x128xbf16>
    %5 = vector.extract_strided_slice %4 {offsets = [0, 0], sizes = [18, 128], strides = [1, 1]} : vector<20x128xbf16> to vector<18x128xbf16>
    %c0_1 = arith.constant 0 : index
    %c0_2 = arith.constant 0 : index
    %6 = vector.load %arg3[%c0_1, %c0_2] : memref<384x128xbf16, #tpu.memory_space<vmem>>, vector<128x128xbf16>
    %cst = arith.constant dense<0.000000e+00> : vector<18x128xf32>
    %7 = tpu.matmul %5, %6, %cst {dimension_numbers = #tpu.dot_dimension_numbers<[1], [0], [0], [1], [0, 0, 1, 1], [], []>} : vector<18x128xbf16>, vector<128x128xbf16>, vector<18x128xf32> -> vector<18x128xf32>
    %8 = vector.extract_strided_slice %4 {offsets = [1, 0], sizes = [18, 128], strides = [1, 1]} : vector<20x128xbf16> to vector<18x128xbf16>
    %c128 = arith.constant 128 : index
    %c0_3 = arith.constant 0 : index
    %9 = vector.load %arg3[%c128, %c0_3] : memref<384x128xbf16, #tpu.memory_space<vmem>>, vector<128x128xbf16>
    %cst_4 = arith.constant dense<0.000000e+00> : vector<18x128xf32>
    %10 = tpu.matmul %8, %9, %cst_4 {dimension_numbers = #tpu.dot_dimension_numbers<[1], [0], [0], [1], [0, 0, 1, 1], [], []>} : vector<18x128xbf16>, vector<128x128xbf16>, vector<18x128xf32> -> vector<18x128xf32>
    %11 = arith.addf %7, %10 : vector<18x128xf32>
    %12 = vector.extract_strided_slice %4 {offsets = [2, 0], sizes = [18, 128], strides = [1, 1]} : vector<20x128xbf16> to vector<18x128xbf16>
    %c256 = arith.constant 256 : index
    %c0_5 = arith.constant 0 : index
    %13 = vector.load %arg3[%c256, %c0_5] : memref<384x128xbf16, #tpu.memory_space<vmem>>, vector<128x128xbf16>
    %cst_6 = arith.constant dense<0.000000e+00> : vector<18x128xf32>
    %14 = tpu.matmul %12, %13, %cst_6 {dimension_numbers = #tpu.dot_dimension_numbers<[1], [0], [0], [1], [0, 0, 1, 1], [], []>} : vector<18x128xbf16>, vector<128x128xbf16>, vector<18x128xf32> -> vector<18x128xf32>
    %15 = arith.addf %11, %14 : vector<18x128xf32>
    %c0_7 = arith.constant 0 : index
    %c0_8 = arith.constant 0 : index
    %16 = vector.load %arg4[%c0_7, %c0_8] : memref<1x128xf32, #tpu.memory_space<vmem>>, vector<1x128xf32>
    %17 = vector.broadcast %16 : vector<1x128xf32> to vector<18x128xf32>
    %18 = arith.mulf %15, %17 : vector<18x128xf32>
    %c0_9 = arith.constant 0 : index
    %c0_10 = arith.constant 0 : index
    %19 = vector.load %arg5[%c0_9, %c0_10] : memref<1x128xf32, #tpu.memory_space<vmem>>, vector<1x128xf32>
    %20 = vector.broadcast %19 : vector<1x128xf32> to vector<18x128xf32>
    %21 = arith.addf %18, %20 : vector<18x128xf32>
    %cst_11 = arith.constant 0.000000e+00 : f32
    %22 = vector.broadcast %cst_11 : f32 to vector<18x128xf32>
    %23 = arith.maximumf %21, %22 : vector<18x128xf32>
    %c1_i32 = arith.constant 1 : i32
    %24 = arith.subi %1, %c1_i32 : i32
    %25 = tpu.iota {dimensions = array<i32: 0>} : vector<18x1xi32>
    %26 = vector.broadcast %24 : i32 to vector<18x1xi32>
    %27 = arith.addi %26, %25 : vector<18x1xi32>
    %c0_i32 = arith.constant 0 : i32
    %28 = vector.broadcast %c0_i32 : i32 to vector<18x1xi32>
    %29 = arith.cmpi sge, %27, %28 : vector<18x1xi32>
    %c16_i32_12 = arith.constant 16 : i32
    %30 = vector.broadcast %c16_i32_12 : i32 to vector<18x1xi32>
    %31 = arith.cmpi slt, %27, %30 : vector<18x1xi32>
    %32 = arith.andi %29, %31 : vector<18x1xi1>
    %cst_13 = arith.constant 0.000000e+00 : f32
    %33 = vector.shape_cast %32 : vector<18x1xi1> to vector<18x1xi1>
    %34 = vector.broadcast %33 : vector<18x1xi1> to vector<18x128xi1>
    %35 = vector.broadcast %cst_13 : f32 to vector<18x128xf32>
    %36 = arith.select %34, %23, %35 : vector<18x128xi1>, vector<18x128xf32>
    %37 = arith.truncf %36 : vector<18x128xf32> to vector<18x128xbf16>
    %38 = vector.extract_strided_slice %37 {offsets = [0, 0], sizes = [16, 128], strides = [1, 1]} : vector<18x128xbf16> to vector<16x128xbf16>
    %c0_14 = arith.constant 0 : index
    %c0_15 = arith.constant 0 : index
    %39 = vector.load %arg6[%c0_14, %c0_15] : memref<384x128xbf16, #tpu.memory_space<vmem>>, vector<128x128xbf16>
    %cst_16 = arith.constant dense<0.000000e+00> : vector<16x128xf32>
    %40 = tpu.matmul %38, %39, %cst_16 {dimension_numbers = #tpu.dot_dimension_numbers<[1], [0], [0], [1], [0, 0, 1, 1], [], []>} : vector<16x128xbf16>, vector<128x128xbf16>, vector<16x128xf32> -> vector<16x128xf32>
    %41 = vector.extract_strided_slice %37 {offsets = [1, 0], sizes = [16, 128], strides = [1, 1]} : vector<18x128xbf16> to vector<16x128xbf16>
    %c128_17 = arith.constant 128 : index
    %c0_18 = arith.constant 0 : index
    %42 = vector.load %arg6[%c128_17, %c0_18] : memref<384x128xbf16, #tpu.memory_space<vmem>>, vector<128x128xbf16>
    %cst_19 = arith.constant dense<0.000000e+00> : vector<16x128xf32>
    %43 = tpu.matmul %41, %42, %cst_19 {dimension_numbers = #tpu.dot_dimension_numbers<[1], [0], [0], [1], [0, 0, 1, 1], [], []>} : vector<16x128xbf16>, vector<128x128xbf16>, vector<16x128xf32> -> vector<16x128xf32>
    %44 = arith.addf %40, %43 : vector<16x128xf32>
    %45 = vector.extract_strided_slice %37 {offsets = [2, 0], sizes = [16, 128], strides = [1, 1]} : vector<18x128xbf16> to vector<16x128xbf16>
    %c256_20 = arith.constant 256 : index
    %c0_21 = arith.constant 0 : index
    %46 = vector.load %arg6[%c256_20, %c0_21] : memref<384x128xbf16, #tpu.memory_space<vmem>>, vector<128x128xbf16>
    %cst_22 = arith.constant dense<0.000000e+00> : vector<16x128xf32>
    %47 = tpu.matmul %45, %46, %cst_22 {dimension_numbers = #tpu.dot_dimension_numbers<[1], [0], [0], [1], [0, 0, 1, 1], [], []>} : vector<16x128xbf16>, vector<128x128xbf16>, vector<16x128xf32> -> vector<16x128xf32>
    %48 = arith.addf %44, %47 : vector<16x128xf32>
    %49 = vector.extract_strided_slice %4 {offsets = [2, 0], sizes = [16, 128], strides = [1, 1]} : vector<20x128xbf16> to vector<16x128xbf16>
    %50 = arith.extf %49 : vector<16x128xbf16> to vector<16x128xf32>
    %c0_23 = arith.constant 0 : index
    %c0_24 = arith.constant 0 : index
    %51 = vector.load %arg7[%c0_23, %c0_24] : memref<1x128xf32, #tpu.memory_space<vmem>>, vector<1x128xf32>
    %52 = vector.broadcast %51 : vector<1x128xf32> to vector<16x128xf32>
    %53 = arith.mulf %48, %52 : vector<16x128xf32>
    %c0_25 = arith.constant 0 : index
    %c0_26 = arith.constant 0 : index
    %54 = vector.load %arg8[%c0_25, %c0_26] : memref<1x128xf32, #tpu.memory_space<vmem>>, vector<1x128xf32>
    %55 = vector.broadcast %54 : vector<1x128xf32> to vector<16x128xf32>
    %56 = arith.addf %53, %55 : vector<16x128xf32>
    %57 = arith.addf %56, %50 : vector<16x128xf32>
    %cst_27 = arith.constant 0.000000e+00 : f32
    %58 = vector.broadcast %cst_27 : f32 to vector<16x128xf32>
    %59 = arith.maximumf %57, %58 : vector<16x128xf32>
    %c0_28 = arith.constant 0 : index
    %c0_29 = arith.constant 0 : index
    %c0_30 = arith.constant 0 : index
    %60 = vector.load %arg9[%c0_28, %c0_29, %c0_30] : memref<1x16x128xf32, #tpu.memory_space<vmem>>, vector<1x16x128xf32>
    %61 = vector.shape_cast %60 : vector<1x16x128xf32> to vector<16x128xf32>
    %62 = vector.shape_cast %59 : vector<16x128xf32> to vector<1x16x128xf32>
    tpu.vector_store %arg9[%c0_28, %c0_29, %c0_30], %62 {strides = array<i32>} : memref<1x16x128xf32, #tpu.memory_space<vmem>>, vector<1x16x128xf32>,
    return
  }
  func.func @transform_0(%arg0: i32, %arg1: i32) -> (i32, i32, i32) {
    %c0_i32 = arith.constant 0 : i32
    %c0_i32_0 = arith.constant 0 : i32
    %c0_i32_1 = arith.constant 0 : i32
    return %arg0, %c0_i32, %c0_i32_0 : i32, i32, i32
  }
  func.func @transform_1(%arg0: i32, %arg1: i32) -> (i32, i32) {
    %c0_i32 = arith.constant 0 : i32
    %c0_i32_0 = arith.constant 0 : i32
    %c0_i32_1 = arith.constant 0 : i32
    return %c0_i32, %c0_i32_0 : i32, i32
  }
  func.func @transform_2(%arg0: i32, %arg1: i32) -> (i32, i32) {
    %c0_i32 = arith.constant 0 : i32
    %c0_i32_0 = arith.constant 0 : i32
    %c0_i32_1 = arith.constant 0 : i32
    return %c0_i32, %c0_i32_0 : i32, i32
  }
  func.func @transform_3(%arg0: i32, %arg1: i32) -> (i32, i32) {
    %c0_i32 = arith.constant 0 : i32
    %c0_i32_0 = arith.constant 0 : i32
    %c0_i32_1 = arith.constant 0 : i32
    return %c0_i32, %c0_i32_0 : i32, i32
  }
  func.func @transform_4(%arg0: i32, %arg1: i32) -> (i32, i32) {
    %c0_i32 = arith.constant 0 : i32
    %c0_i32_0 = arith.constant 0 : i32
    %c0_i32_1 = arith.constant 0 : i32
    return %c0_i32, %c0_i32_0 : i32, i32
  }
  func.func @transform_5(%arg0: i32, %arg1: i32) -> (i32, i32) {
    %c0_i32 = arith.constant 0 : i32
    %c0_i32_0 = arith.constant 0 : i32
    %c0_i32_1 = arith.constant 0 : i32
    return %c0_i32, %c0_i32_0 : i32, i32
  }
  func.func @transform_6(%arg0: i32, %arg1: i32) -> (i32, i32) {
    %c0_i32 = arith.constant 0 : i32
    %c0_i32_0 = arith.constant 0 : i32
    %c0_i32_1 = arith.constant 0 : i32
    return %c0_i32, %c0_i32_0 : i32, i32
  }
  func.func @transform_7(%arg0: i32, %arg1: i32) -> (i32, i32, i32) {
    %c0_i32 = arith.constant 0 : i32
    %c0_i32_0 = arith.constant 0 : i32
    return %arg0, %arg1, %c0_i32 : i32, i32, i32
  }
}

</mosaic_0001>

<bundles_post_ra>
// kernel: tpu_custom_call.1
= control target key start
LH: loop header
LB: loop body
LE: loop exit
PB: predicated region body
PF: predicated region fallthrough
CT: control target
= control target key end

     0   :  { %12 = vsyncpa [#allocation3], 0  ;;  %s2100_s0 = inlined_call_operand.vmem [shape: bf16[2,20,128], index: 0, kind: input, shape index: {}]   ;;  %s2101_s1 = inlined_call_operand.hbm [shape: bf16[384,128], index: 1, kind: input, shape index: {}]   ;;  %s2102_s2 = inlined_call_operand.vmem [shape: f32[1,128], index: 2, kind: input, shape index: {}]   ;;  %s2103_s3 = inlined_call_operand.vmem [shape: f32[1,128], index: 3, kind: input, shape index: {}]   ;;  %s2104_s4 = inlined_call_operand.hbm [shape: bf16[384,128], index: 4, kind: input, shape index: {}]   ;;  %s2105_s5 = inlined_call_operand.vmem [shape: f32[1,128], index: 5, kind: input, shape index: {}]   ;;  %s2106_s6 = inlined_call_operand.vmem [shape: f32[1,128], index: 6, kind: input, shape index: {}]   ;;  %s2107_s7 = inlined_call_operand.hbm [shape: f32[2,16,128], index: 7, kind: output, shape index: {}]  }
   0x1   :  { %13 = vsyncpa [#allocation6], 0 }
   0x2   :  { %14 = vsyncpa [#allocation4], 0 }
   0x3   :  { %16 = vsyncpa [#allocation4 + $0x1], 0  ;;  %s1839_s24 = smov 0   ;;  %s1841_s25 = smov 0  }
   0x4   :  { %s1843_s26 = smov 0   ;;  %s1845_s27 = smov 0  }
   0x5   :  { %s1847_s28 = smov 0   ;;  %s1849_s29 = smov 0  }
   0x6 LB: > { %2114 = sst [smem:[#allocation11_spill]] %s1783_s28  ;;  %s1243_s30 = sadd.s32 4294967295, %s1787_s29   ;;  %s1787_s29 = sphi %s1849_s29, %s22_s29   ;;  %s1783_s28 = sphi %s1847_s28, %s2128_s28   ;;  %s1779_s27 = sphi %s1845_s27, %s2127_s27   ;;  %s1775_s26 = sphi %s1843_s26, %s2131_s26   ;;  %s1771_s25 = sphi %s1841_s25, %s2130_s25   ;;  %s1767_s24 = sphi %s1839_s24, %s2129_s24  }
   0x7   : > { %s1244_s8 = sadd.s32 4294967294, %s1787_s29   ;;  %s34_s9 = sadd.s32 1, %s1783_s28 }
   0x8   : > { %s195_s10 = sadd.s32 1, %s1775_s26  ;;  %p36_p0 = scmp.ge.s32.totalorder %s34_s9, 2 }
   0x9   : > { %p205_p1 = scmp.ne.s32.totalorder %s1775_s26, %s1771_s25  ;;  %p206_p2 = scmp.eq.s32.totalorder %s1243_s30, 1 }
   0xa   : > { %p211_p3 = scmp.ne.s32.totalorder %s1771_s25, %s1767_s24  ;;  %s2133_s9 = smov (%p36_p0, %s34_s9), 0 }
   0xb   : > { %2115 = sst [smem:[#allocation12_spill]] %s2133_s9  ;;  %p1879_p4 = por %p206_p2, %p205_p1 }
   0xc   : > { %p212_p5 = scmp.eq.s32.totalorder %s1244_s8, 1  ;;  %s190_s12 = ssub.s32 %s1783_s28, %s2133_s9 }
   0xd   : > { %s2116_s11 = scalar_select %p1879_p4, 1, 0 }
   0xe   : > { %p1245_p6 = scmp.ge.s32.totalorder %s1787_s29, 1  ;;  %p193_p7 = scmp.eq.s32.totalorder %s190_s12, 0 }
   0xf   : > { %p1886_p8 = por %p212_p5, %p211_p3  ;;  %p219_p9 = scmp.lt.s32.totalorder %s1787_s29, 3 }
  0x10   : > { %s1892_s14 = scalar_select %p193_p7, %s1775_s26, %s195_s10  }
  0x11   : > { %s2117_s13 = scalar_select %p1886_p8, 1, 0 }
  0x12   : > { %2118 = sst [smem:[#allocation13_spill]] %s1892_s14  ;;  %p1894_p10 = pnand %p1245_p6, %p219_p9 }
  0x13   : > { %p1898_p11 = scmp.eq.s32.totalorder %s1243_s30, 0  ;;  %s1789_s17 = smov [#allocation2]  }
  0x14   : > { %s2119_s15 = scalar_select %p1894_p10, 1, 0 }
  0x15   : > { %s2120_s16 = scalar_select %p1898_p11, 1, 0 }
  0x16   : > { %p1521_p12 = pneg %p1894_p10  ;;  %s231_s18 = sshll.u32 %s1789_s17, 4  ;;  %s232_s18 = int_to_ptr.vmem [resolvable:$true] %s231_s18 }
  0x17   : > { %s1790_s20 = smov [#allocation5]   ;;  %s1645_s30 = scalar_lea.hbm %s2101_s1, 3072 }
  0x18   : > { %p1906_p13 = pnand %p1898_p11, %p1521_p12  ;;  %s250_s21 = sshll.u32 %s1790_s20, 4  ;;  %s1910_s21 = int_to_ptr.vmem [resolvable:$true] %s250_s21 }
  0x19   : > { %p1646_p0 = scmp.ne.s32.totalorder %s2101_s1, %s1645_s30  ;;  %p1652_p5 = scmp.lt.u32.totalorder %s1645_s30, %s2101_s1 }
  0x1a   : > { %p1647_p1 = pneg %p1906_p13 }
  0x1c   : > { %p1648_p2 = pnand %p1647_p1, %p1646_p0 }
  0x1e   : > { %p1649_p3 = pneg %p1648_p2 }
  0x20   : > { %p1654_p6 = pnand %p1652_p5, %p1649_p3 }
  0x22   : > { %1657 = shalt.err (!%p1654_p6)
}
  0x23   : > { %s1658_s20 = scalar_lea.vmem %s232_s18, 3072  ;;  %p1666_p8 = scmp.lt.s32.totalorder %s232_s18, %s232_s18 }
  0x24   : > { %p1659_p7 = scmp.ne.s32.totalorder %s232_s18, %s1658_s20  ;;  %p1667_p4 = scmp.lt.s32.totalorder %s1658_s20, %s1658_s20 }
  0x26   : > { %p1661_p9 = pnand %p1659_p7, %p1647_p1  ;;  %p1668_p11 = por %p1667_p4, %p1666_p8 }
  0x28   : > { %p1662_p12 = pneg %p1661_p9 }
  0x2a   : > { %p1669_p10 = pnand %p1668_p11, %p1662_p12 }
  0x2c   : > { %1672 = shalt.err (!%p1669_p10)
}
  0x2d   : > { %s1791_s22 = smov 64   ;;  %s1792_s23 = smov 4  }
  0x2e   : > { %1524 = dma.hbm_to_vmem [thread:$0]  (!%p1906_p13), %s2101_s1, 3072, %s232_s18, [#allocation3], %s1791_s22, %s1791_s22, %s1792_s23  }
  0x2f   : > { %s1673_s17 = scalar_lea.hbm %s2104_s4, 3072 }
  0x30   : > { %p1674_p0 = scmp.ne.s32.totalorder %s2104_s4, %s1673_s17  ;;  %p1680_p10 = scmp.lt.u32.totalorder %s1673_s17, %s2104_s4 }
  0x32   : > { %p1676_p4 = pnand %p1674_p0, %p1647_p1 }
  0x34   : > { %p1677_p8 = pneg %p1676_p4 }
  0x36   : > { %p1682_p11 = pnand %p1680_p10, %p1677_p8 }
  0x38   : > { %1685 = shalt.err (!%p1682_p11)
}
  0x39   : > { %s1686_s18 = scalar_lea.vmem %s1910_s21, 3072  ;;  %p1694_p6 = scmp.lt.s32.totalorder %s1910_s21, %s1910_s21 }
  0x3a   : > { %p1687_p2 = scmp.ne.s32.totalorder %s1910_s21, %s1686_s18  ;;  %p1695_p7 = scmp.lt.s32.totalorder %s1686_s18, %s1686_s18 }
  0x3c   : > { %p1689_p3 = pnand %p1687_p2, %p1647_p1  ;;  %p1696_p9 = por %p1695_p7, %p1694_p6 }
  0x3e   : > { %p1690_p5 = pneg %p1689_p3 }
  0x40   : > { %p1697_p12 = pnand %p1696_p9, %p1690_p5 }
  0x42   : > { %1700 = shalt.err (!%p1697_p12)
}
  0x43   : > { %1527 = dma.hbm_to_vmem [thread:$0]  (!%p1906_p13), %s2104_s4, 3072, %s1910_s21, [#allocation6], %s1791_s22, %s1791_s22, %s1792_s23  }
  0x44   : > { %p2122_p0 = scmp.ne.s32.totalorder %s2119_s15, 0 }
  0x45   : > { %p2123_p4 = scmp.ne.s32.totalorder (!%p2122_p0), %s2120_s16, 0 }
  0x46   : > { %280 = sbr.rel (%p2122_p0) target bundleno = 708 (0x2c4), region = 48 }
  0x4d   : > { %1754 = dma.done.wait (%p2123_p4), [#allocation3], 3072  }
  0x4e   : > { %1756 = vsyncadd (%p2123_p4), [#allocation3], 4294964224 }
  0x4f   : > { %1758 = dma.done.wait (%p2123_p4), [#allocation6], 3072  }
  0x50   : > { %1760 = vsyncadd (%p2123_p4), [#allocation6], 4294964224  ;;  %p316_p1 = scmp.lt.s32.totalorder %s1779_s27, 1  ;;  %v1793_v0 = vmov 0.0   ;;  %v1594_v1 = vld [vmem:[#allocation2 + $0x40] sm:$0xff]   ;;  %v1595_v2 = vld [vmem:[#allocation2 + $0x48] sm:$0xff]   ;;  %v728_v48 = vlaneseq }
  0x51   : > { %1434 = vmatprep.subr.bf16.mxu1 %v1793_v0  ;;  %1374 = vmatprep.subr.bf16.mxu0 %v1594_v1  ;;  %v1596_v3 = vld [vmem:[#allocation2 + $0x50] sm:$0xff]   ;;  %v1597_v4 = vld [vmem:[#allocation2 + $0x58] sm:$0xff]   ;;  %v1598_v11 = vld [vmem:[#allocation2 + $0x60] sm:$0xff]   ;;  %vm371_vm0 = vsmask.f32 7424  ;;  %vm599_vm1 = vcmask 1046528  }
  0x52   : > { %s317_s14 = scalar_select %p316_p1, %s1779_s27, 1  ;;  %1375 = vmatpush3.bf16.msra.mxu0 %v1594_v1  ;;  %v1599_v15 = vld [vmem:[#allocation2 + $0x68] sm:$0xff]   ;;  %v1600_v17 = vld [vmem:[#allocation2 + $0x70] sm:$0xff]   ;;  %v1601_v18 = vld [vmem:[#allocation2 + $0x78] sm:$0xff]   ;;  %vm1794_vm2 = vmmov 0   ;;  %v729_v49 = vshrl.u32 %v728_v48, 7 }
  0x53   : > { %1376 = vmatprep.subr.bf16.mxu0 %v1595_v2  ;;  %v1620_v20 = vld [vmem:[#allocation5 + $0x40] sm:$0xff]   ;;  %v1621_v22 = vld [vmem:[#allocation5 + $0x48] sm:$0xff]   ;;  %v1622_v25 = vld [vmem:[#allocation5 + $0x50] sm:$0xff]   ;;  %1450 = vmatprep.mubr.msk.bf16.mxu1 %vm1794_vm2, %v1793_v0  ;;  %vm1795_vm5 = vmmov 1   ;;  %s313_s10 = sand.u32 1, %s1771_s25   ;;  %vm1116_vm7 = vcmask 1045504  }
  0x54   : > { %s1510_s15 = smul.u32 12, %s317_s14  ;;  %v1604_v21 = vld [vmem:[#allocation2] sm:$0xff]   ;;  %1435 = vmatpush3.bf16.msra.mxu1 %v1620_v20  ;;  %v1605_v24 = vld [vmem:[#allocation2 + $0x8] sm:$0xff]   ;;  %v1606_v26 = vld [vmem:[#allocation2 + $0x10] sm:$0xff]   ;;  %v731_v50 = vadd.s32 16, %v729_v49  ;;  %v733_v57 = vadd.s32 4294967295, %v729_v49 }
  0x55   : > { %1436 = vmatprep.subr.bf16.mxu1 %v1793_v0  ;;  %v1623_v27 = vld [vmem:[#allocation5 + $0x58] sm:$0xff]   ;;  %v1608_v29 = vld [vmem:[#allocation2 + $0x20] sm:$0xff]   ;;  %v1609_v30 = vld [vmem:[#allocation2 + $0x28] sm:$0xff]   ;;  %s1252_s20 = sshll.u32 %s313_s10, 4  ;;  %s2054_s16 = scalar_lea.sflag [#allocation4], %s313_s10 }
  0x56   : > { %s320_s22 = scalar_lea.vmem %s2100_s0, %s1510_s15  ;;  %1377 = vmatpush3.bf16.msra.mxu0 %v1595_v2  ;;  %v1607_v28 = vld [vmem:[#allocation2 + $0x18] sm:$0xff]   ;;  %v1610_v31 = vld [vmem:[#allocation2 + $0x30] sm:$0xff]   ;;  %v1612_v33 = vld [vmem:[#allocation2 + $0x80] sm:$0xff]   ;;  %v735_v54 = vadd.s32 4294967295, %v731_v50  ;;  %vm736_vm4 = vcmp.ge.s32.totalorder %v733_v57, 0  ;;  %s315_s9 = scalar_lea.vmem [#allocation7], %s1252_s20 }
  0x57   : > { %1378 = vmatprep.subr.bf16.mxu0 %v1596_v3  ;;  %v1975_v5 = vld [vmem:[%s320_s22] sm:$0xff]   ;;  %v1977_v6 = vld [vmem:[%s320_s22 + $0x8] sm:$0x3]  ;;  %v1611_v32 = vld [vmem:[#allocation2 + $0x38] sm:$0xff]   ;;  %s1146_s14 = sshll.u32 %s315_s9, 4  ;;  %s1316_s15 = sshll.u32 %s1779_s27, 8  ;;  %s2045_s14 = int_to_ptr.vmem [resolvable:$true] %s1146_s14 }
  0x58   : > { %v1981_v7 = vcombine.low %v1977_v6, %v1977_v6  ;;  %v373_v8 = vshrl.u32 %v1975_v5, 16  ;;  %v375_v9 = vshll.u32 %v1975_v5, 16  ;;  %1437 = vmatpush3.bf16.msra.mxu1 %v1621_v22  ;;  %v600_v34 = vrot.slane %v1975_v5, 1  ;;  %v1613_v36 = vld [vmem:[#allocation2 + $0x88] sm:$0xff]   ;;  %v1614_v38 = vld [vmem:[#allocation2 + $0x90] sm:$0xff]   ;;  %v1615_v39 = vld [vmem:[#allocation2 + $0x98] sm:$0xff]   ;;  %s2050_s22 = scalar_lea.hbm %s2107_s7, %s1316_s15 }
  0x59   : > { %1438 = vmatprep.subr.bf16.mxu1 %v1793_v0  ;;  %v1616_v40 = vld [vmem:[#allocation2 + $0xa0] sm:$0xff]   ;;  %v1617_v41 = vld [vmem:[#allocation2 + $0xa8] sm:$0xff]   ;;  %v1618_v42 = vld [vmem:[#allocation2 + $0xb0] sm:$0xff]   ;;  %vm741_vm3 = vcmp.lt.s32.totalorder %v735_v54, 16  ;;  %s1701_s23 = scalar_lea.vmem %s2045_s14, 256  ;;  %p2124_p8 = scmp.ne.s32.totalorder %s2116_s11, 0 }
  0x5a   : > { %1379 = vmatpush3.bf16.msra.mxu0 %v1596_v3  ;;  %v380_v10 = vshll.u32 %v1981_v7, 16  ;;  %v377_v12 = vrot.slane %v375_v9, 1  ;;  %v384_v19 = vshrl.u32 %v1981_v7, 16  ;;  %v601_v35 = vrot.slane %v1981_v7, 1  ;;  %v1619_v43 = vld [vmem:[#allocation2 + $0xb8] sm:$0xff]   ;;  %v1624_v44 = vld [vmem:[#allocation5 + $0x60] sm:$0xff]   ;;  %vm1298_vm6 = vmpackc.low %vm1795_vm5, %vm736_vm4  ;;  %p1702_p13 = scmp.ne.s32.totalorder %s2045_s14, %s1701_s23 }
  0x5b   : > { %1380 = vmatprep.subr.bf16.mxu0 %v1597_v4  ;;  %v1625_v45 = vld [vmem:[#allocation5 + $0x68] sm:$0xff]   ;;  %v1626_v46 = vld [vmem:[#allocation5 + $0x70] sm:$0xff]   ;;  %v1627_v47 = vld [vmem:[#allocation5 + $0x78] sm:$0xff]   ;;  %s1796_s27 = smov [#allocation7]  }
  0x5c   : > { %v382_v13 = vrot.slane %v380_v10, 1  ;;  %v378_v14 = vor.u32 %v377_v12, %v373_v8  ;;  %1439 = vmatpush3.bf16.msra.mxu1 %v1622_v25  ;;  %v602_v37 = vsel %vm599_vm1, %v600_v34, %v601_v35  ;;  %v1280_v51 = vld [vmem:[%s2102_s2] ss:$0 sm:$0xff]  ;;  %v1631_v25 = vld [vmem:[#allocation5 + $0x18] sm:$0xff]   ;;  %p1703_p10 = pnand %p1702_p13, %p2124_p8  ;;  %s1705_s30 = sshll.u32 %s1796_s27, 4  ;;  %s1706_s30 = int_to_ptr.vmem [resolvable:$false] %s1705_s30 }
  0x5d   : > { %1440 = vmatprep.subr.bf16.mxu1 %v1793_v0  ;;  %v1281_v53 = vld [vmem:[%s2103_s3] ss:$0 sm:$0xff]  ;;  %s1707_s8 = scalar_lea.vmem %s1706_s30, 512  ;;  %p1708_p2 = scmp.lt.s32.totalorder %s2045_s14, %s1706_s30 }
  0x5e   : > { %1381 = vmatpush3.bf16.msra.mxu0 %v1597_v4  ;;  %v383_v16 = vsel %vm371_vm0, %v378_v14, %v382_v13  ;;  %v386_v23 = vor.u32 %v384_v19, %v382_v13  ;;  %v1640_v34 = vld [vmem:[#allocation5 + $0xa0] sm:$0xff]   ;;  %p1704_p11 = pneg %p1703_p10  ;;  %p1709_p3 = scmp.lt.s32.totalorder %s1707_s8, %s1701_s23 }
  0x5f   : > { %1382 = vmatprep.subr.bf16.mxu0 %v1598_v11  ;;  %1390 = vmatprep.mubr.bf16.mxu0 %v383_v16 }
  0x60   : > { %1441 = vmatpush3.bf16.msra.mxu1 %v1623_v27  ;;  %v1633_v27 = vld [vmem:[#allocation5 + $0x28] sm:$0xff]   ;;  %p1710_p5 = por %p1709_p3, %p1708_p2 }
  0x61   : > { %1442 = vmatprep.subr.bf16.mxu1 %v1793_v0 }
  0x62   : > { %1383 = vmatpush3.bf16.msra.mxu0 %v1598_v11  ;;  %p1711_p6 = pnand %p1710_p5, %p1704_p11 }
  0x63   : > { %1384 = vmatprep.subr.bf16.mxu0 %v1599_v15 }
  0x64   : > { %1443 = vmatpush3.bf16.msra.mxu1 %v1624_v44  ;;  %v1310_v44 = vld [vmem:[%s2106_s6] ss:$0 sm:$0xff] }
  0x65   : > { %1444 = vmatprep.subr.bf16.mxu1 %v1793_v0 }
  0x66   : > { %1385 = vmatpush3.bf16.msra.mxu0 %v1599_v15 }
  0x67   : > { %1386 = vmatprep.subr.bf16.mxu0 %v1600_v17 }
  0x68   : > { %1445 = vmatpush3.bf16.msra.mxu1 %v1625_v45 }
  0x69   : > { %1446 = vmatprep.subr.bf16.mxu1 %v1793_v0 }
  0x6a   : > { %1387 = vmatpush3.bf16.msra.mxu0 %v1600_v17 }
  0x6b   : > { %1388 = vmatprep.subr.bf16.mxu0 %v1601_v18 }
  0x6c   : > { %1447 = vmatpush3.bf16.msra.mxu1 %v1626_v46 }
  0x6d   : > { %1448 = vmatprep.subr.bf16.mxu1 %v1793_v0 }
  0x6e   : > { %1389 = vmatpush3.bf16.msra.mxu0 %v1601_v18 }
  0x6f   : > { %1394 = vmatprep.subr.bf16.mxu0 %v1604_v21 }
  0x70   : > { %1449 = vmatpush3.bf16.msra.mxu1 %v1627_v47 }
  0x71   : > { %1391 = vmatmul.mubr.bf16.vlgmr.msra.gmra.mrb[0].mxu0 %v386_v23  ;;  %1454 = vmatprep.subr.bf16.mxu1 %v1793_v0  ;;  %v1629_v23 = vld [vmem:[#allocation5 + $0x8] sm:$0xff]  }
  0x72   : > { %1395 = vmatpush3.bf16.msra.mxu0 %v1604_v21  ;;  %1410 = vmatprep.mubr.bf16.mxu0 %v1975_v5  ;;  %v1628_v21 = vld [vmem:[#allocation5] sm:$0xff]  }
  0x73   : > { %1396 = vmatprep.subr.bf16.mxu0 %v1605_v24 }
  0x76   : > { %1397 = vmatpush3.bf16.msra.mxu0 %v1605_v24  ;;  %v1630_v24 = vld [vmem:[#allocation5 + $0x10] sm:$0xff]  }
  0x77   : > { %1398 = vmatprep.subr.bf16.mxu0 %v1606_v26 }
  0x7a   : > { %1399 = vmatpush3.bf16.msra.mxu0 %v1606_v26  ;;  %v1632_v26 = vld [vmem:[#allocation5 + $0x20] sm:$0xff]  }
  0x7b   : > { %1400 = vmatprep.subr.bf16.mxu0 %v1607_v28 }
  0x7e   : > { %1401 = vmatpush3.bf16.msra.mxu0 %v1607_v28  ;;  %v1634_v28 = vld [vmem:[#allocation5 + $0x30] sm:$0xff]  }
  0x7f   : > { %1402 = vmatprep.subr.bf16.mxu0 %v1608_v29 }
  0x82   : > { %1403 = vmatpush3.bf16.msra.mxu0 %v1608_v29  ;;  %v1635_v29 = vld [vmem:[#allocation5 + $0x38] sm:$0xff]  }
  0x83   : > { %1404 = vmatprep.subr.bf16.mxu0 %v1609_v30 }
  0x86   : > { %1405 = vmatpush3.bf16.msra.mxu0 %v1609_v30  ;;  %v1636_v30 = vld [vmem:[#allocation5 + $0x80] sm:$0xff]  }
  0x87   : > { %1406 = vmatprep.subr.bf16.mxu0 %v1610_v31 }
  0x8a   : > { %1407 = vmatpush3.bf16.msra.mxu0 %v1610_v31  ;;  %v1637_v31 = vld [vmem:[#allocation5 + $0x88] sm:$0xff]  }
  0x8b   : > { %1408 = vmatprep.subr.bf16.mxu0 %v1611_v32 }
  0x8e   : > { %1409 = vmatpush3.bf16.msra.mxu0 %v1611_v32  ;;  %v1638_v32 = vld [vmem:[#allocation5 + $0x90] sm:$0xff]  }
  0x8f   : > { %1414 = vmatprep.subr.bf16.mxu0 %v1612_v33 }
  0x91   : > { %1411 = vmatmul.mubr.bf16.vlgmr.msra.gmra.mrb[0].mxu0 %v1981_v7 }
  0x92   : > { %1415 = vmatpush3.bf16.msra.mxu0 %v1612_v33  ;;  %1430 = vmatprep.mubr.bf16.mxu0 %v602_v37  ;;  %v1639_v33 = vld [vmem:[#allocation5 + $0x98] sm:$0xff]  }
  0x93   : > { %1416 = vmatprep.subr.bf16.mxu0 %v1613_v36  ;;  %v1643_v37 = vld [vmem:[#allocation5 + $0xb8] sm:$0xff]  }
  0x96   : > { %1417 = vmatpush3.bf16.msra.mxu0 %v1613_v36  ;;  %v1642_v36 = vld [vmem:[#allocation5 + $0xb0] sm:$0xff]  }
  0x97   : > { %1418 = vmatprep.subr.bf16.mxu0 %v1614_v38 }
  0x9a   : > { %1419 = vmatpush3.bf16.msra.mxu0 %v1614_v38  ;;  %v1092_v38 = vunpack.c.l.bf16 %v1975_v5 }
  0x9b   : > { %1420 = vmatprep.subr.bf16.mxu0 %v1615_v39 }
  0x9e   : > { %1421 = vmatpush3.bf16.msra.mxu0 %v1615_v39  ;;  %v1093_v39 = vunpack.c.h.bf16 %v1975_v5 }
  0x9f   : > { %1422 = vmatprep.subr.bf16.mxu0 %v1616_v40 }
  0xa2   : > { %1423 = vmatpush3.bf16.msra.mxu0 %v1616_v40  ;;  %v1094_v40 = vunpack.c.l.bf16 %v1977_v6 }
  0xa3   : > { %1424 = vmatprep.subr.bf16.mxu0 %v1617_v41 }
  0xa4   : > { %v1120_v45 = vrot.slane %v1094_v40, 2 }
  0xa6   : > { %1425 = vmatpush3.bf16.msra.mxu0 %v1617_v41  ;;  %v1309_v41 = vld [vmem:[%s2105_s5] ss:$0 sm:$0xff] }
  0xa7   : > { %1426 = vmatprep.subr.bf16.mxu0 %v1618_v42 }
  0xaa   : > { %1427 = vmatpush3.bf16.msra.mxu0 %v1618_v42  ;;  %v1117_v42 = vrot.slane %v1092_v38, 2 }
  0xab   : > { %1428 = vmatprep.subr.bf16.mxu0 %v1619_v43 }
  0xae   : > { %1429 = vmatpush3.bf16.msra.mxu0 %v1619_v43  ;;  %v1118_v43 = vrot.slane %v1093_v39, 2 }
  0xb0   : > { %v1119_v47 = vsel %vm1116_vm7, %v1117_v42, %v1118_v43 }
  0xb1   : > { %1431 = vmatmul.mubr.bf16.vlgmr.msra.gmra.mrb[0].mxu0 %v601_v35  ;;  %v1641_v35 = vld [vmem:[#allocation5 + $0xa8] sm:$0xff]  }
 0x184   : > { %v1432_v52 = vpop.f32.mrb[0].mxu0 }
 0x185   : > { %v713_v55 = vmul.f32 %v1432_v52, %v1280_v51  ;;  %v687_v56 = vpop.f32.mrb[1].mxu0 }
 0x186   : > { %v711_v58 = vmul.f32 %v1280_v51, %v687_v56  ;;  %v1433_v59 = vpop.f32.mrb[2].mxu0 }
 0x187   : > { %v723_v60 = vadd.f32 %v1281_v53, %v713_v55  ;;  %v690_v61 = vpop.f32.mrb[3].mxu0 }
 0x188   : > { %v721_v62 = vadd.f32 %v1281_v53, %v711_v58  ;;  %v712_v63 = vmul.f32 %v1280_v51, %v690_v61  ;;  %v1121_v51 = vsel %vm1116_vm7, %v1118_v43, %v1120_v45 }
 0x189   : > { %v726_v1 = vmax.f32 %v723_v60, 0.0 }
 0x18a   : > { %v724_v2 = vmax.f32 %v721_v62, 0.0  ;;  %v722_v3 = vadd.f32 %v1281_v53, %v712_v63 }
 0x18b   : > { %v753_v4 = vsel %vm741_vm3, %v726_v1, 0.0 }
 0x18c   : > { %v755_v7 = vpack.c.bf16 %v753_v4, %v753_v4  ;;  %v751_v8 = vsel %vm736_vm4, %v724_v2, 0.0  ;;  %v725_v9 = vmax.f32 %v722_v3, 0.0 }
 0x18e   : > { %v754_v10 = vpack.c.bf16 %v725_v9, %v751_v8  ;;  %v1299_v11 = vpack.c.bf16 %v725_v9, %v724_v2  ;;  %v998_v12 = vrot.slane %v755_v7, 1  ;;  %v796_v14 = vshll.u32 %v755_v7, 16 }
 0x190   : > { %v791_v13 = vshll.u32 %v754_v10, 16  ;;  %v997_v15 = vrot.slane %v754_v10, 1  ;;  %v789_v16 = vshrl.u32 %v754_v10, 16  ;;  %v798_v20 = vrot.slane %v796_v14, 1 }
 0x192   : > { %v793_v17 = vrot.slane %v791_v13, 1  ;;  %v999_v18 = vsel %vm599_vm1, %v997_v15, %v998_v12 }
 0x194   : > { %v794_v19 = vor.u32 %v793_v17, %v789_v16 }
 0x196   : > { %v799_v22 = vsel %vm371_vm0, %v794_v19, %v798_v20 }
 0x197   : > { %1451 = vmatmul.mubr.bf16.vlgmr.msra.gmra.mrb[0].mxu1 %v799_v22 }
 0x198   : > { %1455 = vmatpush3.bf16.msra.mxu1 %v1628_v21  ;;  %1470 = vmatprep.mubr.msk.bf16.mxu1 %vm1794_vm2, %v1793_v0 }
 0x199   : > { %1456 = vmatprep.subr.bf16.mxu1 %v1793_v0 }
 0x19c   : > { %1457 = vmatpush3.bf16.msra.mxu1 %v1629_v23 }
 0x19d   : > { %1458 = vmatprep.subr.bf16.mxu1 %v1793_v0 }
 0x1a0   : > { %1459 = vmatpush3.bf16.msra.mxu1 %v1630_v24 }
 0x1a1   : > { %1460 = vmatprep.subr.bf16.mxu1 %v1793_v0 }
 0x1a4   : > { %1461 = vmatpush3.bf16.msra.mxu1 %v1631_v25 }
 0x1a5   : > { %1462 = vmatprep.subr.bf16.mxu1 %v1793_v0 }
 0x1a8   : > { %1463 = vmatpush3.bf16.msra.mxu1 %v1632_v26 }
 0x1a9   : > { %1464 = vmatprep.subr.bf16.mxu1 %v1793_v0 }
 0x1ac   : > { %1465 = vmatpush3.bf16.msra.mxu1 %v1633_v27 }
 0x1ad   : > { %1466 = vmatprep.subr.bf16.mxu1 %v1793_v0 }
 0x1b0   : > { %1467 = vmatpush3.bf16.msra.mxu1 %v1634_v28 }
 0x1b1   : > { %1468 = vmatprep.subr.bf16.mxu1 %v1793_v0 }
 0x1b4   : > { %1469 = vmatpush3.bf16.msra.mxu1 %v1635_v29 }
 0x1b5   : > { %1474 = vmatprep.subr.bf16.mxu1 %v1793_v0 }
 0x1b7   : > { %1471 = vmatmul.mubr.msk.bf16.vlgmr.msra.gmra.mrb[0].mxu1 %vm1298_vm6, %v1299_v11 }
 0x1b8   : > { %1475 = vmatpush3.bf16.msra.mxu1 %v1636_v30  ;;  %1490 = vmatprep.mubr.msk.bf16.mxu1 %vm1794_vm2, %v1793_v0 }
 0x1b9   : > { %1476 = vmatprep.subr.bf16.mxu1 %v1793_v0 }
 0x1bc   : > { %1477 = vmatpush3.bf16.msra.mxu1 %v1637_v31 }
 0x1bd   : > { %1478 = vmatprep.subr.bf16.mxu1 %v1793_v0 }
 0x1c0   : > { %1479 = vmatpush3.bf16.msra.mxu1 %v1638_v32 }
 0x1c1   : > { %1480 = vmatprep.subr.bf16.mxu1 %v1793_v0 }
 0x1c4   : > { %1481 = vmatpush3.bf16.msra.mxu1 %v1639_v33 }
 0x1c5   : > { %1482 = vmatprep.subr.bf16.mxu1 %v1793_v0 }
 0x1c8   : > { %1483 = vmatpush3.bf16.msra.mxu1 %v1640_v34 }
 0x1c9   : > { %1484 = vmatprep.subr.bf16.mxu1 %v1793_v0 }
 0x1cc   : > { %1485 = vmatpush3.bf16.msra.mxu1 %v1641_v35 }
 0x1cd   : > { %1486 = vmatprep.subr.bf16.mxu1 %v1793_v0 }
 0x1d0   : > { %1487 = vmatpush3.bf16.msra.mxu1 %v1642_v36 }
 0x1d1   : > { %1488 = vmatprep.subr.bf16.mxu1 %v1793_v0 }
 0x1d4   : > { %1489 = vmatpush3.bf16.msra.mxu1 %v1643_v37 }
 0x1d7   : > { %1491 = vmatmul.mubr.bf16.vlgmr.msra.gmra.mrb[0].mxu1 %v999_v18 }
 0x2aa   : > { %v1083_v0 = vpop.f32.mrb[0].mxu1 }
 0x2ab   : > { %v1102_v5 = vmul.f32 %v1309_v41, %v1083_v0  ;;  %v1492_v46 = vpop.f32.mrb[1].mxu1 }
 0x2ac   : > { %v1086_v6 = vpop.f32.mrb[2].mxu1 }
 0x2ad   : > { %v1111_v48 = vadd.f32 %v1310_v44, %v1102_v5  ;;  %v1103_v49 = vmul.f32 %v1309_v41, %v1086_v6  ;;  %v1493_v50 = vpop.f32.mrb[3].mxu1 }
 0x2af   : > { %v1124_v52 = vadd.f32 %v1119_v47, %v1111_v48  ;;  %v1112_v53 = vadd.f32 %v1310_v44, %v1103_v49 }
 0x2b1   : > { %v1126_v54 = vmax.f32 %v1124_v52, 0.0  ;;  %v1125_v55 = vadd.f32 %v1121_v51, %v1112_v53 }
 0x2b3   : > { %1128 = vst [vmem:[%s315_s9] sm:$0xff] %v1126_v54  ;;  %v1127_v56 = vmax.f32 %v1125_v55, 0.0 }
 0x2b5   : > { %1129 = vst [vmem:[%s315_s9 + $0x8] sm:$0xff] %v1127_v56 }
 0x2b6   : > { %1714 = shalt.err (!%p1711_p6)
}
 0x2b7   : > { %s1715_s10 = scalar_lea.hbm %s2050_s22, 256  ;;  %s1719_s20 = scalar_lea.hbm %s2107_s7, 512 }
 0x2b8   : > { %p1716_p7 = scmp.ne.s32.totalorder %s2050_s22, %s1715_s10  ;;  %p1720_p0 = scmp.lt.u32.totalorder %s2050_s22, %s2107_s7 }
 0x2b9   : > { %p1721_p4 = scmp.lt.u32.totalorder %s1719_s20, %s1715_s10  ;;  %p1723_p13 = scmp.lt.u32.totalorder %s1715_s10, %s2050_s22 }
 0x2ba   : > { %p1717_p9 = pnand %p1716_p7, %p2124_p8 }
 0x2bb   : > { %p1722_p1 = por %p1721_p4, %p1720_p0 }
 0x2bc   : > { %p1718_p12 = pneg %p1717_p9 }
 0x2bd   : > { %p1724_p10 = por %p1723_p13, %p1722_p1 }
 0x2bf   : > { %p1725_p11 = pnand %p1724_p10, %p1718_p12 }
 0x2c1   : > { %1728 = shalt.err (!%p1725_p11)
}
 0x2c2   : > { %s1797_s9 = smov 128   ;;  %s1798_s15 = smov 8  }
 0x2c3   : > { %1519 = dma.vmem_to_hbm [thread:$0]  (%p2124_p8), %s2045_s14, 256, %s2050_s22, %s2054_s16, %s1797_s9, %s1797_s9, %s1798_s15  }
 0x2c4 PF: > { %p1536_p2 = scmp.ge.s32.totalorder %s1787_s29, 2  ;;  %s1161_s19 = sand.u32 1, %s1767_s24  }
 0x2c5   : > { %p2125_p3 = scmp.ne.s32.totalorder %s2117_s13, 0  ;;  %s1162_s21 = scalar_lea.sflag [#allocation4], %s1161_s19 }
 0x2c7   : > { %p1529_p5 = pnand %p1536_p2, %p2125_p3 }
 0x2c9   : > { %1762 = dma.done.wait (!%p1529_p5), %s1162_s21, 256  }
 0x2ca   : > { %1764 = vsyncadd (!%p1529_p5), %s1162_s21, 4294967040  ;;  %s22_s29 = sadd.s32 1, %s1787_s29   ;;  %s2126_s23 = sld [smem:[#allocation13_spill]] }
 0x2cb   : > { %p19_p6 = scmp.ge.s32.totalorder %s22_s29, 4   ;;  %s2127_s27 = sld [smem:[#allocation11_spill]] }
 0x2cc   : > { %s2128_s28 = sld [smem:[#allocation12_spill]]  ;;  %s2129_s24 = smov %s1771_s25 }
 0x2cd   : > { %s2130_s25 = smov %s1775_s26  ;;  %21 = sbr.rel (!%p19_p6) target bundleno = 6 (0x6), region = 93 }
 0x2d0   : > { %s2131_s26 = smov %s2126_s23 }
 0x2d4   :  { %1167 = vsyncpa [#allocation3], 1 }
 0x2d5   :  { %1169 = vsyncpa [#allocation3 + $0x1], 1 }
 0x2d6   :  { %1170 = vsyncpa [#allocation6], 1 }
 0x2d7   :  { %1171 = vsyncpa [#allocation4], 1 }
 0x2d8   :  { %1173 = vsyncpa [#allocation4 + $0x1], 1 }

</bundles_post_ra>
